<compile_context>
chip_gen: v7x
topology: tpu7x:2x2x1
jax: 0.10.0
libtpu: 0.0.40
codegen_flags: <defaults>
</compile_context>

<pallas_src>
import math
import jax
import jax.numpy as jnp
from jax import lax
from jax.experimental import pallas as pl
from jax.experimental.pallas import tpu as pltpu

ZERO_INIT_LINEAR2 = False


def _round_up(a, b):
    return (a + b - 1) // b * b


def _gelu_exact(x):
    # nn.GELU() default (exact erf) — used only for the f32 reference.
    return 0.5 * x * (1.0 + lax.erf(x * (1.0 / math.sqrt(2.0))))


def _gelu_tanh(x):
    # tanh-approximate GELU: the transcendental goes to the EUP slot instead
    # of a ~25-op VALU erf polynomial.  |delta| vs exact GELU <~ 3e-3.
    return jax.nn.gelu(x, approximate=True)


# ----------------------------------------------------------------------------
# Kernel
# ----------------------------------------------------------------------------
def ffn_kernel(x_ref, w1_ref, b1_ref, w2_ref, b2_ref, o_ref):
    x = x_ref[...]                                   # (TM, D) f32, kept for residual
    h = jnp.dot(x.astype(w1_ref.dtype), w1_ref[...],
                preferred_element_type=jnp.float32)  # (TM, F), f32 accumulate on MXU
    h = _gelu_tanh(h + b1_ref[...])                  # bias broadcast (1, F)
    # dropout: identity in eval mode
    y = jnp.dot(h.astype(w2_ref.dtype), w2_ref[...],
                preferred_element_type=jnp.float32)  # (TM, D), f32 accumulate
    o_ref[...] = (x + y + b2_ref[...]).astype(o_ref.dtype)   # residual + bias2


# ----------------------------------------------------------------------------
# Tiling / VMEM heuristics
# ----------------------------------------------------------------------------
def _vmem_budget_bytes():
    # Generation-aware budget: ~75% of physical VMEM, capped, with a safe
    # fallback when the query is unavailable.
    try:
        cap = pltpu.get_tpu_info().vmem_capacity_bytes
    except Exception:
        cap = 64 * 1024 * 1024
    return min(int(cap * 3 // 4), 96 * 1024 * 1024)


def _vmem_footprint_bytes(tm, D, F):
    return (4 * tm * D * 4          # x + out blocks, double-buffered, f32
            + 2 * D * F * 2         # w1 + w2 resident, bf16, single-buffered
            + (F + D) * 4           # biases, f32
            + 2 * tm * F * 4)       # (TM, F) hidden intermediates, f32


def _choose_tile_m(N, tile_m, D, F, budget):
    if N < 128:
        # Single small tile; 16-row granularity so bf16 sublane packing stays full.
        tm = max(16, _round_up(N, 16))
    else:
        # Multiple of 128 (full MXU passes), at least 2 grid steps so the
        # "parallel" M axis can shard across v7x's 2 TensorCores.
        tm = min(tile_m, max(128, _round_up(pl.cdiv(N, 2), 128)))
        while tm > 128 and _vmem_footprint_bytes(tm, D, F) > budget:
            tm = _round_up(tm // 2, 128)
    return tm


# ----------------------------------------------------------------------------
# Wrapper
# ----------------------------------------------------------------------------
def ffn_pallas(x, w1, b1, w2, b2, *, tile_m=512):
    """x: [B, T, D] float32; w1/w2 bf16 (pre-cast), b1/b2 f32 row vectors.

    Returns x + linear2(gelu(linear1(x))).
    """
    B, T, D = x.shape
    F = w1.shape[1]
    N = B * T

    budget = _vmem_budget_bytes()
    tm = _choose_tile_m(N, tile_m, D, F, budget)
    n_pad = _round_up(N, tm)

    x2 = x.reshape(N, D)
    padded = n_pad != N
    if padded:
        x2 = jnp.pad(x2, ((0, n_pad - N), (0, 0)))

    b1_2 = b1.reshape(1, F)
    b2_2 = b2.reshape(1, D)

    vmem_limit = int(min(budget,
                         max(32 * 1024 * 1024, 2 * _vmem_footprint_bytes(tm, D, F))))

    # Constant blocks (index_map == (0,0) for every step): single-buffer them.
    const1 = pl.Buffered(1)

    out = pl.pallas_call(
        ffn_kernel,
        out_shape=jax.ShapeDtypeStruct((n_pad, D), x.dtype),
        grid_spec=pl.GridSpec(
            grid=(n_pad // tm,),
            in_specs=[
                pl.BlockSpec((tm, D), lambda i: (i, 0)),                       # x (pipelined)
                pl.BlockSpec((D, F), lambda i: (0, 0), pipeline_mode=const1),  # w1 (resident)
                pl.BlockSpec((1, F), lambda i: (0, 0), pipeline_mode=const1),  # b1
                pl.BlockSpec((F, D), lambda i: (0, 0), pipeline_mode=const1),  # w2 (resident)
                pl.BlockSpec((1, D), lambda i: (0, 0), pipeline_mode=const1),  # b2
            ],
            out_specs=pl.BlockSpec((tm, D), lambda i: (i, 0)),
        ),
        # Alias only when x2 is a fresh padded buffer (alias is then real and
        # free).  Otherwise rely on caller-side donation of x to avoid a
        # defensive copy.
        input_output_aliases={0: 0} if padded else {},
        compiler_params=pltpu.CompilerParams(
            dimension_semantics=("parallel",),     # megacore-shardable M axis
            vmem_limit_bytes=vmem_limit,
        ),
    )(x2, w1, b1_2, w2, b2_2)

    if padded:
        out = out[:N]
    return out.reshape(B, T, D)

    # TODO(synk): for very large F (>~2048) / D (>~1024) add an F grid axis with an
    # f32 accumulator scratch (stream (D,tf)/(tf,D) weight slices) so resident
    # weights + the (TM,F) intermediate stay within v7x's 64 MiB VMEM.


def decoder_layer_forward(x, params):
    # sa_block is None, ca_block is None -> only the FFN runs.
    return ffn_pallas(x, params["w1"], params["b1"], params["w2"], params["b2"])


# ----------------------------------------------------------------------------
# Parameters
# ----------------------------------------------------------------------------
def init_params(key, latent_dim, ffn_dim):
    k1, k2, k3, k4 = jax.random.split(key, 4)
    # PyTorch nn.Linear default: U(-1/sqrt(fan_in), 1/sqrt(fan_in))
    lim1 = 1.0 / math.sqrt(latent_dim)
    lim2 = 1.0 / math.sqrt(ffn_dim)
    w1 = jax.random.uniform(k1, (latent_dim, ffn_dim), jnp.float32, -lim1, lim1)
    b1 = jax.random.uniform(k2, (ffn_dim,), jnp.float32, -lim1, lim1)
    if ZERO_INIT_LINEAR2:
        w2 = jnp.zeros((ffn_dim, latent_dim), jnp.float32)
        b2 = jnp.zeros((latent_dim,), jnp.float32)
    else:
        w2 = jax.random.uniform(k3, (ffn_dim, latent_dim), jnp.float32, -lim2, lim2)
        b2 = jax.random.uniform(k4, (latent_dim,), jnp.float32, -lim2, lim2)
    return {"w1": w1, "b1": b1, "w2": w2, "b2": b2}


def prepare_ffn_params(params):
    """One-time cast: weights to bf16 (native MXU dtype), biases to f32 rows."""
    return {
        "w1": params["w1"].astype(jnp.bfloat16),
        "b1": params["b1"].astype(jnp.float32),
        "w2": params["w2"].astype(jnp.bfloat16),
        "b2": params["b2"].astype(jnp.float32),
    }


# ----------------------------------------------------------------------------
# References
# ----------------------------------------------------------------------------
def _reference_f32(x, p):
    # Exact module semantics (f32, erf GELU).
    h = jnp.einsum("btd,df->btf", x, p["w1"]) + p["b1"]
    h = _gelu_exact(h)
    y = jnp.einsum("btf,fd->btd", h, p["w2"]) + p["b2"]
    return x + y


def _reference_recipe(x, p):
    # Same numerical recipe as the kernel (bf16 operands, f32 accumulate,
    # tanh GELU) for a tight check.
    h = jnp.einsum("btd,df->btf", x.astype(jnp.bfloat16),
                   p["w1"].astype(jnp.bfloat16),
                   preferred_element_type=jnp.float32) + p["b1"]
    h = _gelu_tanh(h)
    y = jnp.einsum("btf,fd->btd", h.astype(jnp.bfloat16),
                   p["w2"].astype(jnp.bfloat16),
                   preferred_element_type=jnp.float32) + p["b2"]
    return x + y


if __name__ == "__main__":
    key = jax.random.PRNGKey(0)
    kx, kp = jax.random.split(key)

    # batch, seq, latent_dim, ffn_dim.  D is lane-dense (multiple of 128);
    # T=9 exercises the ragged-row padding path (N=18 -> one 32-row tile).
    B, T, D, F = 2, 9, 256, 512
    x = jax.random.normal(kx, (B, T, D), jnp.float32)
    raw_params = init_params(kp, D, F)
    params = prepare_ffn_params(raw_params)        # bf16 weight cast happens ONCE here

    fwd = jax.jit(decoder_layer_forward)
    out = jax.block_until_ready(fwd(x, params))
    assert out.shape == (B, T, D)

    # Tight check vs. a reference using the same bf16 / f32-accumulate / tanh-GELU recipe.
    ref_recipe = _reference_recipe(x, raw_params)
    assert jnp.allclose(out, ref_recipe, atol=2e-3, rtol=2e-3), "mismatch vs recipe reference"

    # Loose check vs. the full-f32 exact (erf-GELU) reference.
    ref_f32 = _reference_f32(x, raw_params)
    assert jnp.allclose(out, ref_f32, atol=5e-2, rtol=5e-2), "mismatch vs f32 reference"

    # TODO(synk): StylizationBlock path (time_embed_dim is not None) and the
    # attention sub-blocks are not exercised with the given config (None cfgs).
    print("KERNEL_OK")
</pallas_src>

<mosaic_0001>
module attributes {stable_mosaic.version = 11 : i64} {
  func.func @ffn_kernel(%arg0: i32, %arg1: memref<32x256xf32, #tpu.memory_space<vmem>>, %arg2: memref<256x512xbf16, #tpu.memory_space<vmem>>, %arg3: memref<1x512xf32, #tpu.memory_space<vmem>>, %arg4: memref<512x256xbf16, #tpu.memory_space<vmem>>, %arg5: memref<1x256xf32, #tpu.memory_space<vmem>>, %arg6: memref<32x256xf32, #tpu.memory_space<vmem>>) attributes {dimension_semantics = [#tpu.dimension_semantics<parallel>], iteration_bounds = array<i64: 1>, scalar_prefetch = 0 : i64, scratch_operands = 0 : i64, tpu.core_type = #tpu.core_type<tc>, window_params = [{transform_indices = @transform_0, window_bounds = array<i64: 32, 256>}, {pipeline_mode = #tpu.pipeline_mode<synchronous>, transform_indices = @transform_1, window_bounds = array<i64: 256, 512>}, {pipeline_mode = #tpu.pipeline_mode<synchronous>, transform_indices = @transform_2, window_bounds = array<i64: 1, 512>}, {pipeline_mode = #tpu.pipeline_mode<synchronous>, transform_indices = @transform_3, window_bounds = array<i64: 512, 256>}, {pipeline_mode = #tpu.pipeline_mode<synchronous>, transform_indices = @transform_4, window_bounds = array<i64: 1, 256>}, {transform_indices = @transform_5, window_bounds = array<i64: 32, 256>}]} {
    %c0 = arith.constant 0 : index
    %c0_0 = arith.constant 0 : index
    %0 = vector.load %arg1[%c0, %c0_0] : memref<32x256xf32, #tpu.memory_space<vmem>>, vector<32x256xf32>
    %1 = arith.truncf %0 : vector<32x256xf32> to vector<32x256xbf16>
    %c0_1 = arith.constant 0 : index
    %c0_2 = arith.constant 0 : index
    %2 = vector.load %arg2[%c0_1, %c0_2] : memref<256x512xbf16, #tpu.memory_space<vmem>>, vector<256x512xbf16>
    %cst = arith.constant dense<0.000000e+00> : vector<32x512xf32>
    %3 = tpu.matmul %1, %2, %cst {dimension_numbers = #tpu.dot_dimension_numbers<[1], [0], [0], [1], [0, 0, 1, 1], [], []>} : vector<32x256xbf16>, vector<256x512xbf16>, vector<32x512xf32> -> vector<32x512xf32>
    %c0_3 = arith.constant 0 : index
    %c0_4 = arith.constant 0 : index
    %4 = vector.load %arg3[%c0_3, %c0_4] : memref<1x512xf32, #tpu.memory_space<vmem>>, vector<1x512xf32>
    %5 = vector.broadcast %4 : vector<1x512xf32> to vector<32x512xf32>
    %6 = arith.addf %3, %5 : vector<32x512xf32>
    %7 = arith.mulf %6, %6 : vector<32x512xf32>
    %8 = arith.mulf %6, %7 : vector<32x512xf32>
    %cst_5 = arith.constant 4.471500e-02 : f32
    %9 = vector.broadcast %cst_5 : f32 to vector<32x512xf32>
    %10 = arith.mulf %9, %8 : vector<32x512xf32>
    %11 = arith.addf %6, %10 : vector<32x512xf32>
    %cst_6 = arith.constant 0.797884583 : f32
    %12 = vector.broadcast %cst_6 : f32 to vector<32x512xf32>
    %13 = arith.mulf %12, %11 : vector<32x512xf32>
    %14 = math.tanh %13 : vector<32x512xf32>
    %cst_7 = arith.constant 1.000000e+00 : f32
    %15 = vector.broadcast %cst_7 : f32 to vector<32x512xf32>
    %16 = arith.addf %15, %14 : vector<32x512xf32>
    %cst_8 = arith.constant 5.000000e-01 : f32
    %17 = vector.broadcast %cst_8 : f32 to vector<32x512xf32>
    %18 = arith.mulf %17, %16 : vector<32x512xf32>
    %19 = arith.mulf %6, %18 : vector<32x512xf32>
    %20 = arith.truncf %19 : vector<32x512xf32> to vector<32x512xbf16>
    %c0_9 = arith.constant 0 : index
    %c0_10 = arith.constant 0 : index
    %21 = vector.load %arg4[%c0_9, %c0_10] : memref<512x256xbf16, #tpu.memory_space<vmem>>, vector<512x256xbf16>
    %cst_11 = arith.constant dense<0.000000e+00> : vector<32x256xf32>
    %22 = tpu.matmul %20, %21, %cst_11 {dimension_numbers = #tpu.dot_dimension_numbers<[1], [0], [0], [1], [0, 0, 1, 1], [], []>} : vector<32x512xbf16>, vector<512x256xbf16>, vector<32x256xf32> -> vector<32x256xf32>
    %23 = arith.addf %0, %22 : vector<32x256xf32>
    %c0_12 = arith.constant 0 : index
    %c0_13 = arith.constant 0 : index
    %24 = vector.load %arg5[%c0_12, %c0_13] : memref<1x256xf32, #tpu.memory_space<vmem>>, vector<1x256xf32>
    %25 = vector.broadcast %24 : vector<1x256xf32> to vector<32x256xf32>
    %26 = arith.addf %23, %25 : vector<32x256xf32>
    %c0_14 = arith.constant 0 : index
    %c0_15 = arith.constant 0 : index
    %27 = vector.load %arg6[%c0_14, %c0_15] : memref<32x256xf32, #tpu.memory_space<vmem>>, vector<32x256xf32>
    tpu.vector_store %arg6[%c0_14, %c0_15], %26 {strides = array<i32>} : memref<32x256xf32, #tpu.memory_space<vmem>>, vector<32x256xf32>,
    return
  }
  func.func @transform_0(%arg0: i32) -> (i32, i32) {
    %c0_i32 = arith.constant 0 : i32
    %c0_i32_0 = arith.constant 0 : i32
    return %arg0, %c0_i32 : i32, i32
  }
  func.func @transform_1(%arg0: i32) -> (i32, i32) {
    %c0_i32 = arith.constant 0 : i32
    %c0_i32_0 = arith.constant 0 : i32
    %c0_i32_1 = arith.constant 0 : i32
    return %c0_i32, %c0_i32_0 : i32, i32
  }
  func.func @transform_2(%arg0: i32) -> (i32, i32) {
    %c0_i32 = arith.constant 0 : i32
    %c0_i32_0 = arith.constant 0 : i32
    %c0_i32_1 = arith.constant 0 : i32
    return %c0_i32, %c0_i32_0 : i32, i32
  }
  func.func @transform_3(%arg0: i32) -> (i32, i32) {
    %c0_i32 = arith.constant 0 : i32
    %c0_i32_0 = arith.constant 0 : i32
    %c0_i32_1 = arith.constant 0 : i32
    return %c0_i32, %c0_i32_0 : i32, i32
  }
  func.func @transform_4(%arg0: i32) -> (i32, i32) {
    %c0_i32 = arith.constant 0 : i32
    %c0_i32_0 = arith.constant 0 : i32
    %c0_i32_1 = arith.constant 0 : i32
    return %c0_i32, %c0_i32_0 : i32, i32
  }
  func.func @transform_5(%arg0: i32) -> (i32, i32) {
    %c0_i32 = arith.constant 0 : i32
    %c0_i32_0 = arith.constant 0 : i32
    return %arg0, %c0_i32 : i32, i32
  }
}

</mosaic_0001>

<bundles_post_ra>
// kernel: decoder_layer_forward.1
= control target key start
LH: loop header
LB: loop body
LE: loop exit
PB: predicated region body
PF: predicated region fallthrough
CT: control target
= control target key end

     0   :  { %10 = vsyncpa [#allocation3], 0  ;;  %s1960_s0 = inlined_call_operand.vmem [shape: f32[32,256], index: 0, kind: input, shape index: {}, may-alias: {0,5}]   ;;  %s1961_s1 = inlined_call_operand.hbm [shape: bf16[256,512], index: 1, kind: input, shape index: {}]   ;;  %s1962_s2 = inlined_call_operand.vmem [shape: f32[1,512], index: 2, kind: input, shape index: {}]   ;;  %s1963_s3 = inlined_call_operand.hbm [shape: bf16[512,256], index: 3, kind: input, shape index: {}]   ;;  %s1964_s4 = inlined_call_operand.vmem [shape: f32[1,256], index: 4, kind: input, shape index: {}]   ;;  %s1965_s5 = inlined_call_operand.vmem [shape: f32[32,256], index: 5, kind: output, shape index: {}, may-alias: {0,5}]  }
   0x1   :  { %11 = vsyncpa [#allocation5], 0  ;;  %s1672_s18 = smov [#allocation2]   ;;  %s1624_s22 = scalar_lea.hbm %s1961_s1, 8192 }
   0x2   :  { %s19_s19 = sshll.u32 %s1672_s18, 4  ;;  %p1625_p0 = scmp.ne.s32.totalorder %s1961_s1, %s1624_s22  ;;  %s20_s19 = int_to_ptr.vmem [resolvable:$true] %s19_s19 }
   0x3   :  { %p1628_p1 = scmp.lt.u32.totalorder %s1624_s22, %s1961_s1 }
   0x5   :  { %p1630_p2 = pnand %p1628_p1, %p1625_p0 }
   0x7   :  { %1633 = shalt.err (!%p1630_p2)
}
   0x8   :  { %s1634_s27 = scalar_lea.vmem %s20_s19, 8192  ;;  %p1639_p4 = scmp.lt.s32.totalorder %s20_s19, %s20_s19 }
   0x9   :  { %p1635_p3 = scmp.ne.s32.totalorder %s20_s19, %s1634_s27  ;;  %p1640_p5 = scmp.lt.s32.totalorder %s1634_s27, %s1634_s27 }
   0xb   :  { %p1641_p6 = por %p1640_p5, %p1639_p4 }
   0xd   :  { %p1642_p7 = pnand %p1641_p6, %p1635_p3 }
   0xf   :  { %1645 = shalt.err (!%p1642_p7)
}
  0x10   :  { %s1673_s28 = smov 256   ;;  %s1674_s29 = smov 16  }
  0x11   :  { %25 = dma.hbm_to_vmem [thread:$0]  %s1961_s1, 8192, %s20_s19, [#allocation3], %s1673_s28, %s1673_s28, %s1674_s29  }
  0x12   :  { %s1675_s7 = smov [#allocation4]   ;;  %s1646_s11 = scalar_lea.hbm %s1963_s3, 8192 }
  0x13   :  { %s33_s8 = sshll.u32 %s1675_s7, 4  ;;  %p1647_p8 = scmp.ne.s32.totalorder %s1963_s3, %s1646_s11  ;;  %s34_s8 = int_to_ptr.vmem [resolvable:$true] %s33_s8 }
  0x14   :  { %p1650_p9 = scmp.lt.u32.totalorder %s1646_s11, %s1963_s3 }
  0x16   :  { %p1652_p10 = pnand %p1650_p9, %p1647_p8 }
  0x18   :  { %1655 = shalt.err (!%p1652_p10)
}
  0x19   :  { %s1656_s16 = scalar_lea.vmem %s34_s8, 8192  ;;  %p1661_p12 = scmp.lt.s32.totalorder %s34_s8, %s34_s8 }
  0x1a   :  { %p1657_p11 = scmp.ne.s32.totalorder %s34_s8, %s1656_s16  ;;  %p1662_p13 = scmp.lt.s32.totalorder %s1656_s16, %s1656_s16 }
  0x1c   :  { %p1663_p0 = por %p1662_p13, %p1661_p12 }
  0x1e   :  { %p1664_p1 = pnand %p1663_p0, %p1657_p11 }
  0x20   :  { %1667 = shalt.err (!%p1664_p1)
}
  0x21   :  { %s1676_s1 = smov 128   ;;  %s1677_s17 = smov 8  }
  0x22   :  { %39 = dma.hbm_to_vmem [thread:$0]  %s1963_s3, 8192, %s34_s8, [#allocation5], %s1676_s1, %s1676_s1, %s1677_s17  }
  0x23   :  { %1668 = dma.done.wait [#allocation3], 8192  }
  0x24   :  { %1669 = vsyncadd [#allocation3], 4294959104 }
  0x25   :  { %1670 = dma.done.wait [#allocation5], 8192  }
  0x26   :  { %1671 = vsyncadd [#allocation5], 4294959104  ;;  %v1398_v0 = vld [vmem:[#allocation2 + $0x4] ss:$16 sps:$4 sm:$0xff]   ;;  %v1400_v1 = vld [vmem:[#allocation2] ss:$16 sps:$4 sm:$0xff]  }
  0x27   :  { %466 = vmatprep.subr.bf16.mxu1 %v1398_v0  ;;  %v1401_v2 = vld [vmem:[#allocation2 + $0x24] ss:$16 sps:$4 sm:$0xff]   ;;  %v1403_v3 = vld [vmem:[#allocation2 + $0x20] ss:$16 sps:$4 sm:$0xff]   ;;  %v49_v13 = vld [vmem:[%s1960_s0 + $0x8] sm:$0xff] }
  0x28   :  { %467 = vmatpush1.bf16.msra.mxu1 %v1400_v1  ;;  %v1404_v4 = vld [vmem:[#allocation2 + $0x44] ss:$16 sps:$4 sm:$0xff]   ;;  %v1406_v5 = vld [vmem:[#allocation2 + $0x40] ss:$16 sps:$4 sm:$0xff]   ;;  %v51_v14 = vld [vmem:[%s1960_s0 + $0x18] sm:$0xff] }
  0x29   :  { %468 = vmatprep.subr.bf16.mxu1 %v1401_v2  ;;  %v1407_v6 = vld [vmem:[#allocation2 + $0x64] ss:$16 sps:$4 sm:$0xff]   ;;  %v1409_v7 = vld [vmem:[#allocation2 + $0x60] ss:$16 sps:$4 sm:$0xff]   ;;  %v1738_v15 = vpack.c.bf16 %v51_v14, %v49_v13  ;;  %v1448_v46 = vld [vmem:[#allocation2 + $0xc] ss:$16 sps:$4 sm:$0xff]  }
  0x2a   :  { %v1410_v8 = vld [vmem:[#allocation2 + $0x84] ss:$16 sps:$4 sm:$0xff]   ;;  %v1412_v9 = vld [vmem:[#allocation2 + $0x80] ss:$16 sps:$4 sm:$0xff]   ;;  %v1754_v47 = vld [vmem:[%s1960_s0 + $0x28] sm:$0xff] }
  0x2b   :  { %v1413_v10 = vld [vmem:[#allocation2 + $0xa4] ss:$16 sps:$4 sm:$0xff]   ;;  %v1415_v11 = vld [vmem:[#allocation2 + $0xa0] ss:$16 sps:$4 sm:$0xff]   ;;  %498 = vmatprep.mubr.bf16.mxu1 %v1738_v15  ;;  %v1759_v48 = vld [vmem:[%s1960_s0 + $0x38] sm:$0xff] }
  0x2c   :  { %469 = vmatpush1.bf16.msra.mxu1 %v1403_v3  ;;  %v1416_v12 = vld [vmem:[#allocation2 + $0xc4] ss:$16 sps:$4 sm:$0xff]   ;;  %v1418_v16 = vld [vmem:[#allocation2 + $0xc0] ss:$16 sps:$4 sm:$0xff]   ;;  %v1446_v51 = vld [vmem:[#allocation2 + $0x8] ss:$16 sps:$4 sm:$0xff]   ;;  %v1767_v54 = vpack.c.bf16 %v1759_v48, %v1754_v47 }
  0x2d   :  { %470 = vmatprep.subr.bf16.mxu1 %v1404_v4  ;;  %v1419_v17 = vld [vmem:[#allocation2 + $0xe4] ss:$16 sps:$4 sm:$0xff]   ;;  %v1421_v18 = vld [vmem:[#allocation2 + $0xe0] ss:$16 sps:$4 sm:$0xff]   ;;  %v1451_v53 = vld [vmem:[#allocation2 + $0x2c] ss:$16 sps:$4 sm:$0xff]  }
  0x2e   :  { %v1422_v19 = vld [vmem:[#allocation2 + $0x104] ss:$16 sps:$4 sm:$0xff]   ;;  %v1424_v20 = vld [vmem:[#allocation2 + $0x100] ss:$16 sps:$4 sm:$0xff]   ;;  %v1449_v57 = vld [vmem:[#allocation2 + $0x28] ss:$16 sps:$4 sm:$0xff]  }
  0x2f   :  { %v1425_v21 = vld [vmem:[#allocation2 + $0x124] ss:$16 sps:$4 sm:$0xff]   ;;  %v1427_v22 = vld [vmem:[#allocation2 + $0x120] ss:$16 sps:$4 sm:$0xff]   ;;  %v1454_v60 = vld [vmem:[#allocation2 + $0x4c] ss:$16 sps:$4 sm:$0xff]  }
  0x30   :  { %471 = vmatpush1.bf16.msra.mxu1 %v1406_v5  ;;  %v1428_v23 = vld [vmem:[#allocation2 + $0x144] ss:$16 sps:$4 sm:$0xff]   ;;  %v1430_v24 = vld [vmem:[#allocation2 + $0x140] ss:$16 sps:$4 sm:$0xff]   ;;  %v1452_v63 = vld [vmem:[#allocation2 + $0x48] ss:$16 sps:$4 sm:$0xff]  }
  0x31   :  { %472 = vmatprep.subr.bf16.mxu1 %v1407_v6  ;;  %v1431_v25 = vld [vmem:[#allocation2 + $0x164] ss:$16 sps:$4 sm:$0xff]   ;;  %v1433_v26 = vld [vmem:[#allocation2 + $0x160] ss:$16 sps:$4 sm:$0xff]   ;;  %v1457_v0 = vld [vmem:[#allocation2 + $0x6c] ss:$16 sps:$4 sm:$0xff]  }
  0x32   :  { %v1434_v27 = vld [vmem:[#allocation2 + $0x184] ss:$16 sps:$4 sm:$0xff]   ;;  %v1496_v29 = vld [vmem:[#allocation4] ss:$8 sps:$4 sm:$0xff]   ;;  %v1499_v33 = vld [vmem:[#allocation4 + $0x10] ss:$8 sps:$4 sm:$0xff]  }
  0x33   :  { %v1494_v28 = vld [vmem:[#allocation4 + $0x4] ss:$8 sps:$4 sm:$0xff]   ;;  %v1436_v30 = vld [vmem:[#allocation2 + $0x180] ss:$16 sps:$4 sm:$0xff]   ;;  %v1497_v31 = vld [vmem:[#allocation4 + $0x14] ss:$8 sps:$4 sm:$0xff]  }
  0x34   :  { %473 = vmatpush1.bf16.msra.mxu1 %v1409_v7  ;;  %v1437_v32 = vld [vmem:[#allocation2 + $0x1a4] ss:$16 sps:$4 sm:$0xff]   ;;  %1108 = vmatprep.subr.bf16.mxu0 %v1494_v28  ;;  %v1439_v35 = vld [vmem:[#allocation2 + $0x1a0] ss:$16 sps:$4 sm:$0xff]   ;;  %v1455_v1 = vld [vmem:[#allocation2 + $0x68] ss:$16 sps:$4 sm:$0xff]  }
  0x35   :  { %474 = vmatprep.subr.bf16.mxu1 %v1410_v8  ;;  %1109 = vmatpush1.bf16.msra.mxu0 %v1496_v29  ;;  %v1500_v34 = vld [vmem:[#allocation4 + $0x24] ss:$8 sps:$4 sm:$0xff]   ;;  %v1502_v37 = vld [vmem:[#allocation4 + $0x20] ss:$8 sps:$4 sm:$0xff]   ;;  %v1503_v40 = vld [vmem:[#allocation4 + $0x34] ss:$8 sps:$4 sm:$0xff]  }
  0x36   :  { %1110 = vmatprep.subr.bf16.mxu0 %v1497_v31  ;;  %v1440_v36 = vld [vmem:[#allocation2 + $0x1c4] ss:$16 sps:$4 sm:$0xff]   ;;  %v1442_v38 = vld [vmem:[#allocation2 + $0x1c0] ss:$16 sps:$4 sm:$0xff]   ;;  %v1460_v2 = vld [vmem:[#allocation2 + $0x8c] ss:$16 sps:$4 sm:$0xff]  }
  0x37   :  { %v1443_v39 = vld [vmem:[#allocation2 + $0x1e4] ss:$16 sps:$4 sm:$0xff]   ;;  %v1505_v41 = vld [vmem:[#allocation4 + $0x30] ss:$8 sps:$4 sm:$0xff]   ;;  %v1508_v49 = vld [vmem:[#allocation4 + $0x40] ss:$8 sps:$4 sm:$0xff]  }
  0x38   :  { %475 = vmatpush1.bf16.msra.mxu1 %v1412_v9  ;;  %v1506_v42 = vld [vmem:[#allocation4 + $0x44] ss:$8 sps:$4 sm:$0xff]   ;;  %v1445_v43 = vld [vmem:[#allocation2 + $0x1e0] ss:$16 sps:$4 sm:$0xff]   ;;  %v1509_v50 = vld [vmem:[#allocation4 + $0x54] ss:$8 sps:$4 sm:$0xff]  }
  0x39   :  { %476 = vmatprep.subr.bf16.mxu1 %v1413_v10  ;;  %1111 = vmatpush1.bf16.msra.mxu0 %v1499_v33  ;;  %v1744_v44 = vld [vmem:[%s1960_s0] sm:$0xff]  ;;  %v1749_v45 = vld [vmem:[%s1960_s0 + $0x10] sm:$0xff]  ;;  %v1458_v3 = vld [vmem:[#allocation2 + $0x88] ss:$16 sps:$4 sm:$0xff]  }
  0x3a   :  { %1112 = vmatprep.subr.bf16.mxu0 %v1500_v34  ;;  %v1763_v52 = vpack.c.bf16 %v1749_v45, %v1744_v44  ;;  %v1511_v55 = vld [vmem:[#allocation4 + $0x50] ss:$8 sps:$4 sm:$0xff]   ;;  %v1512_v56 = vld [vmem:[#allocation4 + $0x64] ss:$8 sps:$4 sm:$0xff]   ;;  %v1514_v61 = vld [vmem:[#allocation4 + $0x60] ss:$8 sps:$4 sm:$0xff]  }
  0x3b   :  { %v1772_v58 = vld [vmem:[%s1960_s0 + $0x20] sm:$0xff]  ;;  %v1777_v59 = vld [vmem:[%s1960_s0 + $0x30] sm:$0xff]  ;;  %v1463_v4 = vld [vmem:[#allocation2 + $0xac] ss:$16 sps:$4 sm:$0xff]  }
  0x3c   :  { %477 = vmatpush1.bf16.msra.mxu1 %v1415_v11  ;;  %v58_v62 = vpack.c.bf16 %v1777_v59, %v1772_v58  ;;  %v1461_v5 = vld [vmem:[#allocation2 + $0xa8] ss:$16 sps:$4 sm:$0xff]   ;;  %v1466_v6 = vld [vmem:[#allocation2 + $0xcc] ss:$16 sps:$4 sm:$0xff]  }
  0x3d   :  { %478 = vmatprep.subr.bf16.mxu1 %v1416_v12  ;;  %1113 = vmatpush1.bf16.msra.mxu0 %v1502_v37  ;;  %v1464_v7 = vld [vmem:[#allocation2 + $0xc8] ss:$16 sps:$4 sm:$0xff]   ;;  %v1469_v8 = vld [vmem:[#allocation2 + $0xec] ss:$16 sps:$4 sm:$0xff]  }
  0x3e   :  { %1114 = vmatprep.subr.bf16.mxu0 %v1503_v40  ;;  %v1467_v9 = vld [vmem:[#allocation2 + $0xe8] ss:$16 sps:$4 sm:$0xff]   ;;  %v1472_v10 = vld [vmem:[#allocation2 + $0x10c] ss:$16 sps:$4 sm:$0xff]  }
  0x3f   :  { %v1470_v11 = vld [vmem:[#allocation2 + $0x108] ss:$16 sps:$4 sm:$0xff]   ;;  %v1475_v12 = vld [vmem:[#allocation2 + $0x12c] ss:$16 sps:$4 sm:$0xff]  }
  0x40   :  { %479 = vmatpush1.bf16.msra.mxu1 %v1418_v16  ;;  %v1473_v13 = vld [vmem:[#allocation2 + $0x128] ss:$16 sps:$4 sm:$0xff]   ;;  %v1478_v14 = vld [vmem:[#allocation2 + $0x14c] ss:$16 sps:$4 sm:$0xff]  }
  0x41   :  { %480 = vmatprep.subr.bf16.mxu1 %v1419_v17  ;;  %1115 = vmatpush1.bf16.msra.mxu0 %v1505_v41  ;;  %v1481_v16 = vld [vmem:[#allocation2 + $0x16c] ss:$16 sps:$4 sm:$0xff]   ;;  %v1479_v17 = vld [vmem:[#allocation2 + $0x168] ss:$16 sps:$4 sm:$0xff]  }
  0x42   :  { %1116 = vmatprep.subr.bf16.mxu0 %v1506_v42  ;;  %v1518_v28 = vld [vmem:[#allocation4 + $0x84] ss:$8 sps:$4 sm:$0xff]   ;;  %v1520_v29 = vld [vmem:[#allocation4 + $0x80] ss:$8 sps:$4 sm:$0xff]   ;;  %v1523_v31 = vld [vmem:[#allocation4 + $0x90] ss:$8 sps:$4 sm:$0xff]  }
  0x43   :  { %v1526_v33 = vld [vmem:[#allocation4 + $0xa0] ss:$8 sps:$4 sm:$0xff]   ;;  %v1527_v34 = vld [vmem:[#allocation4 + $0xb4] ss:$8 sps:$4 sm:$0xff]   ;;  %v1536_v40 = vld [vmem:[#allocation4 + $0xe4] ss:$8 sps:$4 sm:$0xff]  }
  0x44   :  { %481 = vmatpush1.bf16.msra.mxu1 %v1421_v18  ;;  %v1484_v18 = vld [vmem:[#allocation2 + $0x18c] ss:$16 sps:$4 sm:$0xff]   ;;  %v1532_v37 = vld [vmem:[#allocation4 + $0xc0] ss:$8 sps:$4 sm:$0xff]  }
  0x45   :  { %482 = vmatprep.subr.bf16.mxu1 %v1422_v19  ;;  %1117 = vmatpush1.bf16.msra.mxu0 %v1508_v49  ;;  %v1482_v19 = vld [vmem:[#allocation2 + $0x188] ss:$16 sps:$4 sm:$0xff]   ;;  %v1539_v42 = vld [vmem:[#allocation4 + $0xf4] ss:$8 sps:$4 sm:$0xff]   ;;  %v126_v49 = vlaneseq }
  0x46   :  { %1118 = vmatprep.subr.bf16.mxu0 %v1509_v50  ;;  %v1538_v41 = vld [vmem:[#allocation4 + $0xe0] ss:$8 sps:$4 sm:$0xff]  }
  0x47   :  { %v1786_v50 = vshrl.u32 %v126_v49, 7 }
  0x48   :  { %483 = vmatpush1.bf16.msra.mxu1 %v1424_v20  ;;  %v1487_v20 = vld [vmem:[#allocation2 + $0x1ac] ss:$16 sps:$4 sm:$0xff]  }
  0x49   :  { %484 = vmatprep.subr.bf16.mxu1 %v1425_v21  ;;  %1119 = vmatpush1.bf16.msra.mxu0 %v1511_v55  ;;  %v1485_v21 = vld [vmem:[#allocation2 + $0x1a8] ss:$16 sps:$4 sm:$0xff]  }
  0x4a   :  { %1120 = vmatprep.subr.bf16.mxu0 %v1512_v56 }
  0x4c   :  { %485 = vmatpush1.bf16.msra.mxu1 %v1427_v22  ;;  %v1490_v22 = vld [vmem:[#allocation2 + $0x1cc] ss:$16 sps:$4 sm:$0xff]  }
  0x4d   :  { %486 = vmatprep.subr.bf16.mxu1 %v1428_v23  ;;  %1121 = vmatpush1.bf16.msra.mxu0 %v1514_v61  ;;  %v1488_v23 = vld [vmem:[#allocation2 + $0x1c8] ss:$16 sps:$4 sm:$0xff]  }
  0x50   :  { %487 = vmatpush1.bf16.msra.mxu1 %v1430_v24  ;;  %v1493_v24 = vld [vmem:[#allocation2 + $0x1ec] ss:$16 sps:$4 sm:$0xff]  }
  0x51   :  { %488 = vmatprep.subr.bf16.mxu1 %v1431_v25  ;;  %v1491_v25 = vld [vmem:[#allocation2 + $0x1e8] ss:$16 sps:$4 sm:$0xff]  }
  0x54   :  { %489 = vmatpush1.bf16.msra.mxu1 %v1433_v26  ;;  %v1515_v26 = vld [vmem:[#allocation4 + $0x74] ss:$8 sps:$4 sm:$0xff]  }
  0x55   :  { %490 = vmatprep.subr.bf16.mxu1 %v1434_v27  ;;  %v1517_v27 = vld [vmem:[#allocation4 + $0x70] ss:$8 sps:$4 sm:$0xff]   ;;  %1122 = vmatprep.subr.bf16.mxu0 %v1515_v26 }
  0x56   :  { %1123 = vmatpush1.bf16.msra.mxu0 %v1517_v27 }
  0x57   :  { %1124 = vmatprep.subr.bf16.mxu0 %v1518_v28 }
  0x58   :  { %491 = vmatpush1.bf16.msra.mxu1 %v1436_v30  ;;  %v1521_v30 = vld [vmem:[#allocation4 + $0x94] ss:$8 sps:$4 sm:$0xff]  }
  0x59   :  { %492 = vmatprep.subr.bf16.mxu1 %v1437_v32  ;;  %v1524_v32 = vld [vmem:[#allocation4 + $0xa4] ss:$8 sps:$4 sm:$0xff]  }
  0x5a   :  { %1125 = vmatpush1.bf16.msra.mxu0 %v1520_v29 }
  0x5b   :  { %1126 = vmatprep.subr.bf16.mxu0 %v1521_v30 }
  0x5c   :  { %493 = vmatpush1.bf16.msra.mxu1 %v1439_v35  ;;  %v1529_v35 = vld [vmem:[#allocation4 + $0xb0] ss:$8 sps:$4 sm:$0xff]  }
  0x5d   :  { %494 = vmatprep.subr.bf16.mxu1 %v1440_v36  ;;  %v1530_v36 = vld [vmem:[#allocation4 + $0xc4] ss:$8 sps:$4 sm:$0xff]  }
  0x5e   :  { %1127 = vmatpush1.bf16.msra.mxu0 %v1523_v31 }
  0x5f   :  { %1128 = vmatprep.subr.bf16.mxu0 %v1524_v32 }
  0x60   :  { %495 = vmatpush1.bf16.msra.mxu1 %v1442_v38  ;;  %v1533_v38 = vld [vmem:[#allocation4 + $0xd4] ss:$8 sps:$4 sm:$0xff]  }
  0x61   :  { %496 = vmatprep.subr.bf16.mxu1 %v1443_v39  ;;  %v1535_v39 = vld [vmem:[#allocation4 + $0xd0] ss:$8 sps:$4 sm:$0xff]  }
  0x62   :  { %1129 = vmatpush1.bf16.msra.mxu0 %v1526_v33 }
  0x63   :  { %1130 = vmatprep.subr.bf16.mxu0 %v1527_v34 }
  0x64   :  { %497 = vmatpush1.bf16.msra.mxu1 %v1445_v43  ;;  %v1541_v43 = vld [vmem:[#allocation4 + $0xf0] ss:$8 sps:$4 sm:$0xff]  }
  0x65   :  { %519 = vmatprep.subr.bf16.mxu1 %v1448_v46  ;;  %v1544_v46 = vld [vmem:[#allocation4 + $0x104] ss:$8 sps:$4 sm:$0xff]  }
  0x66   :  { %1131 = vmatpush1.bf16.msra.mxu0 %v1529_v35 }
  0x67   :  { %499 = vmatmul.mubr.bf16.vlgmr.msra.gmra.mrb[0].mxu1 %v1763_v52  ;;  %1132 = vmatprep.subr.bf16.mxu0 %v1530_v36 }
  0x68   :  { %520 = vmatpush1.bf16.msra.mxu1 %v1446_v51  ;;  %508 = vmatprep.mubr.bf16.mxu1 %v1767_v54  ;;  %v128_v51 = vsub.s32 0, %v1786_v50 }
  0x69   :  { %521 = vmatprep.subr.bf16.mxu1 %v1451_v53  ;;  %v132_v53 = vsub.s32 1, %v1786_v50 }
  0x6a   :  { %1133 = vmatpush1.bf16.msra.mxu0 %v1532_v37 }
  0x6b   :  { %1134 = vmatprep.subr.bf16.mxu0 %v1533_v38 }
  0x6c   :  { %522 = vmatpush1.bf16.msra.mxu1 %v1449_v57 }
  0x6d   :  { %523 = vmatprep.subr.bf16.mxu1 %v1454_v60 }
  0x6e   :  { %1135 = vmatpush1.bf16.msra.mxu0 %v1535_v39 }
  0x6f   :  { %509 = vmatmul.mubr.bf16.gmra.mrb[4].mxu1 %v58_v62  ;;  %1136 = vmatprep.subr.bf16.mxu0 %v1536_v40 }
  0x70   :  { %524 = vmatpush1.bf16.msra.mxu1 %v1452_v63  ;;  %551 = vmatprep.mubr.bf16.mxu1 %v1738_v15  ;;  %v1476_v15 = vld [vmem:[#allocation2 + $0x148] ss:$16 sps:$4 sm:$0xff]  }
  0x71   :  { %525 = vmatprep.subr.bf16.mxu1 %v1457_v0 }
  0x72   :  { %1137 = vmatpush1.bf16.msra.mxu0 %v1538_v41 }
  0x73   :  { %1138 = vmatprep.subr.bf16.mxu0 %v1539_v42 }
  0x74   :  { %526 = vmatpush1.bf16.msra.mxu1 %v1455_v1 }
  0x75   :  { %527 = vmatprep.subr.bf16.mxu1 %v1460_v2 }
  0x76   :  { %1139 = vmatpush1.bf16.msra.mxu0 %v1541_v43 }
  0x77   :  { %1161 = vmatprep.subr.bf16.mxu0 %v1544_v46 }
  0x78   :  { %528 = vmatpush1.bf16.msra.mxu1 %v1458_v3 }
  0x79   :  { %529 = vmatprep.subr.bf16.mxu1 %v1463_v4 }
  0x7c   :  { %530 = vmatpush1.bf16.msra.mxu1 %v1461_v5 }
  0x7d   :  { %531 = vmatprep.subr.bf16.mxu1 %v1466_v6 }
  0x80   :  { %532 = vmatpush1.bf16.msra.mxu1 %v1464_v7 }
  0x81   :  { %533 = vmatprep.subr.bf16.mxu1 %v1469_v8 }
  0x84   :  { %534 = vmatpush1.bf16.msra.mxu1 %v1467_v9 }
  0x85   :  { %535 = vmatprep.subr.bf16.mxu1 %v1472_v10 }
  0x88   :  { %536 = vmatpush1.bf16.msra.mxu1 %v1470_v11 }
  0x89   :  { %537 = vmatprep.subr.bf16.mxu1 %v1475_v12 }
  0x8c   :  { %538 = vmatpush1.bf16.msra.mxu1 %v1473_v13 }
  0x8d   :  { %539 = vmatprep.subr.bf16.mxu1 %v1478_v14 }
  0x90   :  { %540 = vmatpush1.bf16.msra.mxu1 %v1476_v15 }
  0x91   :  { %541 = vmatprep.subr.bf16.mxu1 %v1481_v16 }
  0x94   :  { %542 = vmatpush1.bf16.msra.mxu1 %v1479_v17 }
  0x95   :  { %543 = vmatprep.subr.bf16.mxu1 %v1484_v18 }
  0x98   :  { %544 = vmatpush1.bf16.msra.mxu1 %v1482_v19 }
  0x99   :  { %545 = vmatprep.subr.bf16.mxu1 %v1487_v20 }
  0x9c   :  { %546 = vmatpush1.bf16.msra.mxu1 %v1485_v21 }
  0x9d   :  { %547 = vmatprep.subr.bf16.mxu1 %v1490_v22 }
  0xa0   :  { %548 = vmatpush1.bf16.msra.mxu1 %v1488_v23 }
  0xa1   :  { %549 = vmatprep.subr.bf16.mxu1 %v1493_v24 }
  0xa4   :  { %550 = vmatpush1.bf16.msra.mxu1 %v1491_v25 }
  0xa7   :  { %552 = vmatmul.mubr.bf16.vlgmr.msra.gmra.mrb[8].mxu1 %v1763_v52  ;;  %v1792_v52 = vld [vmem:[%s1962_s2] sm:$0xf] }
  0xa8   :  { %561 = vmatprep.mubr.bf16.mxu1 %v1767_v54  ;;  %v129_v54 = vrot.slane %v1792_v52, %v128_v51  ;;  %v133_v55 = vrot.slane %v1792_v52, %v132_v53 }
  0xaf   :  { %562 = vmatmul.mubr.bf16.gmra.mrb[12].mxu1 %v58_v62 }
 0x13a   :  { %v500_v56 = vpop.f32.mrb[0].mxu1 }
 0x13b   :  { %v1801_v57 = vadd.f32 %v500_v56, %v129_v54  ;;  %v502_v60 = vpop.f32.mrb[1].mxu1 }
 0x13c   :  { %v1803_v61 = vadd.f32 %v502_v60, %v133_v55  ;;  %v504_v62 = vpop.f32.mrb[2].mxu1 }
 0x13d   :  { %v572_v63 = vmul.f32 %v1801_v57, %v1801_v57  ;;  %v1807_v0 = vadd.f32 %v504_v62, %v129_v54  ;;  %v506_v1 = vpop.f32.mrb[3].mxu1 }
 0x13e   :  { %v573_v2 = vmul.f32 %v1803_v61, %v1803_v61  ;;  %v1811_v3 = vadd.f32 %v506_v1, %v133_v55 }
 0x13f   :  { %v588_v4 = vmul.f32 %v572_v63, %v1801_v57  ;;  %v576_v5 = vmul.f32 %v1807_v0, %v1807_v0 }
 0x140   :  { %v589_v6 = vmul.f32 %v573_v2, %v1803_v61  ;;  %v577_v7 = vmul.f32 %v1811_v3, %v1811_v3 }
 0x141   :  { %v604_v8 = vmul.f32 0.044715, %v588_v4  ;;  %v592_v9 = vmul.f32 %v576_v5, %v1807_v0 }
 0x142   :  { %v605_v10 = vmul.f32 0.044715, %v589_v6  ;;  %v593_v11 = vmul.f32 %v577_v7, %v1811_v3  ;;  %v510_v12 = vpop.f32.mrb[4].mxu1 }
 0x143   :  { %v620_v13 = vadd.f32 %v604_v8, %v1801_v57  ;;  %v608_v14 = vmul.f32 0.044715, %v592_v9  ;;  %v1822_v15 = vadd.f32 %v510_v12, %v129_v54  ;;  %v512_v16 = vpop.f32.mrb[5].mxu1 }
 0x144   :  { %v609_v17 = vmul.f32 0.044715, %v593_v11  ;;  %v1824_v18 = vadd.f32 %v512_v16, %v133_v55  ;;  %v514_v19 = vpop.f32.mrb[6].mxu1  ;;  %v621_v20 = vadd.f32 %v605_v10, %v1803_v61 }
 0x145   :  { %v636_v21 = vmul.f32 0.7978846, %v620_v13  ;;  %v624_v22 = vadd.f32 %v608_v14, %v1807_v0  ;;  %v580_v23 = vmul.f32 %v1822_v15, %v1822_v15  ;;  %v1830_v24 = vadd.f32 %v514_v19, %v129_v54  ;;  %v516_v25 = vpop.f32.mrb[7].mxu1 }
 0x146   :  { %v581_v26 = vmul.f32 %v1824_v18, %v1824_v18  ;;  %v1834_v27 = vadd.f32 %v516_v25, %v133_v55  ;;  %v625_v28 = vadd.f32 %v609_v17, %v1811_v3  ;;  %v637_v29 = vmul.f32 0.7978846, %v621_v20  ;;  %v1542_v25 = vld [vmem:[#allocation4 + $0x100] ss:$8 sps:$4 sm:$0xff]  }
 0x147   :  { %1590 = vtanh.f32 %v636_v21  ;;  %v640_v30 = vmul.f32 0.7978846, %v624_v22  ;;  %v596_v31 = vmul.f32 %v580_v23, %v1822_v15  ;;  %v584_v32 = vmul.f32 %v1830_v24, %v1830_v24 }
 0x148   :  { %v597_v33 = vmul.f32 %v581_v26, %v1824_v18  ;;  %v585_v34 = vmul.f32 %v1834_v27, %v1834_v27  ;;  %v641_v35 = vmul.f32 0.7978846, %v625_v28  ;;  %1592 = vtanh.f32 %v637_v29  ;;  %v1547_v29 = vld [vmem:[#allocation4 + $0x114] ss:$8 sps:$4 sm:$0xff]  }
 0x149   :  { %1594 = vtanh.f32 %v640_v30  ;;  %v612_v36 = vmul.f32 0.044715, %v596_v31  ;;  %v600_v37 = vmul.f32 %v584_v32, %v1830_v24 }
 0x14a   :  { %v613_v38 = vmul.f32 0.044715, %v597_v33  ;;  %v601_v39 = vmul.f32 %v585_v34, %v1834_v27  ;;  %1596 = vtanh.f32 %v641_v35  ;;  %v1550_v35 = vld [vmem:[#allocation4 + $0x124] ss:$8 sps:$4 sm:$0xff]  }
 0x14b   :  { %v628_v40 = vadd.f32 %v612_v36, %v1822_v15  ;;  %v616_v41 = vmul.f32 0.044715, %v600_v37 }
 0x14c   :  { %v629_v42 = vadd.f32 %v613_v38, %v1824_v18  ;;  %v617_v43 = vmul.f32 0.044715, %v601_v39  ;;  %v1548_v39 = vld [vmem:[#allocation4 + $0x120] ss:$8 sps:$4 sm:$0xff]  }
 0x14d   :  { %v644_v46 = vmul.f32 0.7978846, %v628_v40  ;;  %v632_v49 = vadd.f32 %v616_v41, %v1830_v24  ;;  %v1553_v41 = vld [vmem:[#allocation4 + $0x134] ss:$8 sps:$4 sm:$0xff]  }
 0x14e   :  { %v645_v54 = vmul.f32 0.7978846, %v629_v42  ;;  %v633_v55 = vadd.f32 %v617_v43, %v1834_v27  ;;  %v1556_v42 = vld [vmem:[#allocation4 + $0x144] ss:$8 sps:$4 sm:$0xff]   ;;  %v1559_v43 = vld [vmem:[#allocation4 + $0x154] ss:$8 sps:$4 sm:$0xff]  }
 0x14f   :  { %1598 = vtanh.f32 %v644_v46  ;;  %v648_v56 = vmul.f32 0.7978846, %v632_v49  ;;  %v1560_v46 = vld [vmem:[#allocation4 + $0x160] ss:$8 sps:$4 sm:$0xff]   ;;  %v136_v49 = vsub.s32 2, %v1786_v50 }
 0x150   :  { %1600 = vtanh.f32 %v645_v54  ;;  %v649_v60 = vmul.f32 0.7978846, %v633_v55  ;;  %v1565_v54 = vld [vmem:[#allocation4 + $0x174] ss:$8 sps:$4 sm:$0xff]   ;;  %v140_v55 = vsub.s32 3, %v1786_v50 }
 0x151   :  { %v1591_v62 = vpop.eup %1590  ;;  %1602 = vtanh.f32 %v648_v56  ;;  %v137_v56 = vrot.slane %v1792_v52, %v136_v49 }
 0x152   :  { %v1593_v63 = vpop.eup %1592  ;;  %1604 = vtanh.f32 %v649_v60  ;;  %v668_v1 = vadd.f32 1.0, %v1591_v62  ;;  %v1563_v60 = vld [vmem:[#allocation4 + $0x170] ss:$8 sps:$4 sm:$0xff]   ;;  %v141_v62 = vrot.slane %v1792_v52, %v140_v55 }
 0x153   :  { %v1595_v2 = vpop.eup %1594  ;;  %v669_v4 = vadd.f32 1.0, %v1593_v63  ;;  %v1568_v63 = vld [vmem:[#allocation4 + $0x184] ss:$8 sps:$4 sm:$0xff]  }
 0x154   :  { %v1597_v5 = vpop.eup %1596  ;;  %v672_v6 = vadd.f32 1.0, %v1595_v2  ;;  %v684_v7 = vmul.f32 0.5, %v668_v1 }
 0x155   :  { %v673_v8 = vadd.f32 1.0, %v1597_v5  ;;  %v685_v9 = vmul.f32 0.5, %v669_v4  ;;  %v1566_v5 = vld [vmem:[#allocation4 + $0x180] ss:$8 sps:$4 sm:$0xff]  }
 0x156   :  { %v688_v10 = vmul.f32 0.5, %v672_v6  ;;  %v700_v12 = vmul.f32 %v684_v7, %v1801_v57 }
 0x157   :  { %v689_v11 = vmul.f32 0.5, %v673_v8  ;;  %v701_v16 = vmul.f32 %v685_v9, %v1803_v61  ;;  %v1571_v8 = vld [vmem:[#allocation4 + $0x194] ss:$8 sps:$4 sm:$0xff]  }
 0x158   :  { %v704_v13 = vmul.f32 %v688_v10, %v1807_v0 }
 0x159   :  { %v1599_v14 = vpop.eup %1598  ;;  %v705_v17 = vmul.f32 %v689_v11, %v1811_v3  ;;  %v1545_v3 = vld [vmem:[#allocation4 + $0x110] ss:$8 sps:$4 sm:$0xff]  }
 0x15a   :  { %v1601_v19 = vpop.eup %1600  ;;  %v716_v20 = vpack.c.bf16 %v704_v13, %v700_v12  ;;  %v676_v21 = vadd.f32 1.0, %v1599_v14 }
 0x15b   :  { %v1603_v22 = vpop.eup %1602  ;;  %v717_v23 = vpack.c.bf16 %v705_v17, %v701_v16  ;;  %v677_v26 = vadd.f32 1.0, %v1601_v19  ;;  %v1569_v16 = vld [vmem:[#allocation4 + $0x190] ss:$8 sps:$4 sm:$0xff]  }
 0x15c   :  { %v1605_v28 = vpop.eup %1604  ;;  %v680_v30 = vadd.f32 1.0, %v1603_v22  ;;  %v692_v31 = vmul.f32 0.5, %v676_v21 }
 0x15d   :  { %1140 = vmatprep.mubr.bf16.mxu0 %v717_v23  ;;  %v681_v57 = vadd.f32 1.0, %v1605_v28  ;;  %v693_v32 = vmul.f32 0.5, %v677_v26 }
 0x15e   :  { %1141 = vmatmul.mubr.bf16.vlgmr.msra.gmra.mrb[0].mxu0 %v716_v20  ;;  %v696_v0 = vmul.f32 0.5, %v680_v30  ;;  %v708_v61 = vmul.f32 %v692_v31, %v1822_v15  ;;  %v1551_v15 = vld [vmem:[#allocation4 + $0x130] ss:$8 sps:$4 sm:$0xff]   ;;  %v1574_v20 = vld [vmem:[#allocation4 + $0x1a4] ss:$8 sps:$4 sm:$0xff]  }
 0x15f   :  { %1162 = vmatpush1.bf16.msra.mxu0 %v1542_v25  ;;  %v697_v33 = vmul.f32 0.5, %v681_v57  ;;  %v709_v34 = vmul.f32 %v693_v32, %v1824_v18  ;;  %v1554_v18 = vld [vmem:[#allocation4 + $0x140] ss:$8 sps:$4 sm:$0xff]  }
 0x160   :  { %1163 = vmatprep.subr.bf16.mxu0 %v1547_v29  ;;  %v712_v36 = vmul.f32 %v696_v0, %v1830_v24  ;;  %v1557_v24 = vld [vmem:[#allocation4 + $0x150] ss:$8 sps:$4 sm:$0xff]   ;;  %v1572_v57 = vld [vmem:[#allocation4 + $0x1a0] ss:$8 sps:$4 sm:$0xff]  }
 0x161   :  { %v713_v37 = vmul.f32 %v697_v33, %v1834_v27  ;;  %v1562_v27 = vld [vmem:[#allocation4 + $0x164] ss:$8 sps:$4 sm:$0xff]   ;;  %v1577_v33 = vld [vmem:[#allocation4 + $0x1b4] ss:$8 sps:$4 sm:$0xff]  }
 0x162   :  { %v720_v38 = vpack.c.bf16 %v712_v36, %v708_v61 }
 0x163   :  { %1164 = vmatpush1.bf16.msra.mxu0 %v1545_v3  ;;  %v721_v40 = vpack.c.bf16 %v713_v37, %v709_v34 }
 0x164   :  { %1165 = vmatprep.subr.bf16.mxu0 %v1550_v35 }
 0x165   :  { %1150 = vmatprep.mubr.bf16.mxu0 %v721_v40 }
 0x166   :  { %1151 = vmatmul.mubr.bf16.gmra.mrb[4].mxu0 %v720_v38 }
 0x167   :  { %1166 = vmatpush1.bf16.msra.mxu0 %v1548_v39 }
 0x168   :  { %1167 = vmatprep.subr.bf16.mxu0 %v1553_v41 }
 0x16b   :  { %1168 = vmatpush1.bf16.msra.mxu0 %v1551_v15 }
 0x16c   :  { %1169 = vmatprep.subr.bf16.mxu0 %v1556_v42 }
 0x16f   :  { %1170 = vmatpush1.bf16.msra.mxu0 %v1554_v18 }
 0x170   :  { %1171 = vmatprep.subr.bf16.mxu0 %v1559_v43 }
 0x173   :  { %1172 = vmatpush1.bf16.msra.mxu0 %v1557_v24  ;;  %v1575_v24 = vld [vmem:[#allocation4 + $0x1b0] ss:$8 sps:$4 sm:$0xff]  }
 0x174   :  { %1173 = vmatprep.subr.bf16.mxu0 %v1562_v27 }
 0x177   :  { %1174 = vmatpush1.bf16.msra.mxu0 %v1560_v46 }
 0x178   :  { %1175 = vmatprep.subr.bf16.mxu0 %v1565_v54  ;;  %v1580_v54 = vld [vmem:[#allocation4 + $0x1c4] ss:$8 sps:$4 sm:$0xff]  }
 0x17a   :  { %v553_v1 = vpop.f32.mrb[8].mxu1 }
 0x17b   :  { %v1861_v2 = vadd.f32 %v553_v1, %v137_v56  ;;  %v555_v4 = vpop.f32.mrb[9].mxu1  ;;  %1176 = vmatpush1.bf16.msra.mxu0 %v1563_v60 }
 0x17c   :  { %v1863_v6 = vadd.f32 %v555_v4, %v141_v62  ;;  %v557_v7 = vpop.f32.mrb[10].mxu1  ;;  %1177 = vmatprep.subr.bf16.mxu0 %v1568_v63  ;;  %v1578_v4 = vld [vmem:[#allocation4 + $0x1c0] ss:$8 sps:$4 sm:$0xff]  }
 0x17d   :  { %v574_v9 = vmul.f32 %v1861_v2, %v1861_v2  ;;  %v1867_v10 = vadd.f32 %v557_v7, %v137_v56  ;;  %v559_v11 = vpop.f32.mrb[11].mxu1 }
 0x17e   :  { %v575_v52 = vmul.f32 %v1863_v6, %v1863_v6  ;;  %v1871_v12 = vadd.f32 %v559_v11, %v141_v62 }
 0x17f   :  { %v590_v13 = vmul.f32 %v574_v9, %v1861_v2  ;;  %v578_v14 = vmul.f32 %v1867_v10, %v1867_v10  ;;  %1178 = vmatpush1.bf16.msra.mxu0 %v1566_v5 }
 0x180   :  { %v591_v17 = vmul.f32 %v575_v52, %v1863_v6  ;;  %v579_v19 = vmul.f32 %v1871_v12, %v1871_v12  ;;  %1179 = vmatprep.subr.bf16.mxu0 %v1571_v8  ;;  %v1583_v8 = vld [vmem:[#allocation4 + $0x1d4] ss:$8 sps:$4 sm:$0xff]  }
 0x181   :  { %v606_v21 = vmul.f32 0.044715, %v590_v13  ;;  %v594_v22 = vmul.f32 %v578_v14, %v1867_v10 }
 0x182   :  { %v607_v23 = vmul.f32 0.044715, %v591_v17  ;;  %v595_v25 = vmul.f32 %v579_v19, %v1871_v12  ;;  %v563_v26 = vpop.f32.mrb[12].mxu1  ;;  %v1586_v19 = vld [vmem:[#allocation4 + $0x1e4] ss:$8 sps:$4 sm:$0xff]  }
 0x183   :  { %v622_v28 = vadd.f32 %v606_v21, %v1861_v2  ;;  %v610_v29 = vmul.f32 0.044715, %v594_v22  ;;  %v1882_v30 = vadd.f32 %v563_v26, %v137_v56  ;;  %v565_v31 = vpop.f32.mrb[13].mxu1  ;;  %1180 = vmatpush1.bf16.msra.mxu0 %v1569_v16  ;;  %v1581_v16 = vld [vmem:[#allocation4 + $0x1d0] ss:$8 sps:$4 sm:$0xff]  }
 0x184   :  { %v623_v32 = vadd.f32 %v607_v23, %v1863_v6  ;;  %v611_v0 = vmul.f32 0.044715, %v595_v25  ;;  %v1885_v61 = vadd.f32 %v565_v31, %v141_v62  ;;  %v567_v3 = vpop.f32.mrb[14].mxu1  ;;  %1181 = vmatprep.subr.bf16.mxu0 %v1574_v20  ;;  %v1584_v25 = vld [vmem:[#allocation4 + $0x1e0] ss:$8 sps:$4 sm:$0xff]  }
 0x185   :  { %v638_v34 = vmul.f32 0.7978846, %v622_v28  ;;  %v626_v35 = vadd.f32 %v610_v29, %v1867_v10  ;;  %v582_v36 = vmul.f32 %v1882_v30, %v1882_v30  ;;  %v1890_v37 = vadd.f32 %v567_v3, %v137_v56  ;;  %v569_v38 = vpop.f32.mrb[15].mxu1 }
 0x186   :  { %v639_v39 = vmul.f32 0.7978846, %v623_v32  ;;  %v627_v40 = vadd.f32 %v611_v0, %v1871_v12  ;;  %v583_v41 = vmul.f32 %v1885_v61, %v1885_v61  ;;  %v1895_v15 = vadd.f32 %v569_v38, %v141_v62 }
 0x187   :  { %1606 = vtanh.f32 %v638_v34  ;;  %v642_v42 = vmul.f32 0.7978846, %v626_v35  ;;  %v598_v18 = vmul.f32 %v582_v36, %v1882_v30  ;;  %v586_v43 = vmul.f32 %v1890_v37, %v1890_v37  ;;  %1182 = vmatpush1.bf16.msra.mxu0 %v1572_v57  ;;  %v1589_v57 = vld [vmem:[#allocation4 + $0x1f4] ss:$8 sps:$4 sm:$0xff]  }
 0x188   :  { %1608 = vtanh.f32 %v639_v39  ;;  %v643_v27 = vmul.f32 0.7978846, %v627_v40  ;;  %v599_v46 = vmul.f32 %v583_v41, %v1885_v61  ;;  %v587_v49 = vmul.f32 %v1895_v15, %v1895_v15  ;;  %1183 = vmatprep.subr.bf16.mxu0 %v1577_v33  ;;  %v1587_v33 = vld [vmem:[#allocation4 + $0x1f0] ss:$8 sps:$4 sm:$0xff]  }
 0x189   :  { %1610 = vtanh.f32 %v642_v42  ;;  %v614_v55 = vmul.f32 0.044715, %v598_v18  ;;  %v602_v56 = vmul.f32 %v586_v43, %v1890_v37 }
 0x18a   :  { %1612 = vtanh.f32 %v643_v27  ;;  %v615_v60 = vmul.f32 0.044715, %v599_v46  ;;  %v603_v62 = vmul.f32 %v587_v49, %v1895_v15 }
 0x18b   :  { %v630_v63 = vadd.f32 %v614_v55, %v1882_v30  ;;  %v618_v1 = vmul.f32 0.044715, %v602_v56  ;;  %1184 = vmatpush1.bf16.msra.mxu0 %v1575_v24 }
 0x18c   :  { %v631_v5 = vadd.f32 %v615_v60, %v1885_v61  ;;  %v619_v7 = vmul.f32 0.044715, %v603_v62  ;;  %1185 = vmatprep.subr.bf16.mxu0 %v1580_v54 }
 0x18d   :  { %v646_v9 = vmul.f32 0.7978846, %v630_v63  ;;  %v634_v11 = vadd.f32 %v618_v1, %v1890_v37 }
 0x18e   :  { %v647_v52 = vmul.f32 0.7978846, %v631_v5  ;;  %v635_v13 = vadd.f32 %v619_v7, %v1895_v15 }
 0x18f   :  { %1614 = vtanh.f32 %v646_v9  ;;  %v650_v14 = vmul.f32 0.7978846, %v634_v11  ;;  %1186 = vmatpush1.bf16.msra.mxu0 %v1578_v4  ;;  %v1222_v4 = vld [vmem:[%s1964_s4] sm:$0x3] }
 0x190   :  { %1616 = vtanh.f32 %v647_v52  ;;  %v651_v17 = vmul.f32 0.7978846, %v635_v13  ;;  %1187 = vmatprep.subr.bf16.mxu0 %v1583_v8  ;;  %v1227_v5 = vrot.slane %v1222_v4, %v128_v51  ;;  %v1623_v51 = vld [vmem:[%s1960_s0 + $0x18] sm:$0xff] }
 0x191   :  { %v1607_v20 = vpop.eup %1606  ;;  %1618 = vtanh.f32 %v650_v14 }
 0x192   :  { %v1609_v21 = vpop.eup %1608  ;;  %v670_v22 = vadd.f32 1.0, %v1607_v20  ;;  %1620 = vtanh.f32 %v651_v17 }
 0x193   :  { %v1611_v23 = vpop.eup %1610  ;;  %1188 = vmatpush1.bf16.msra.mxu0 %v1581_v16  ;;  %v671_v26 = vadd.f32 1.0, %v1609_v21 }
 0x194   :  { %v1613_v28 = vpop.eup %1612  ;;  %v686_v29 = vmul.f32 0.5, %v670_v22  ;;  %v674_v31 = vadd.f32 1.0, %v1611_v23  ;;  %1189 = vmatprep.subr.bf16.mxu0 %v1586_v19 }
 0x195   :  { %v675_v32 = vadd.f32 1.0, %v1613_v28  ;;  %v687_v0 = vmul.f32 0.5, %v671_v26 }
 0x196   :  { %v690_v3 = vmul.f32 0.5, %v674_v31  ;;  %v702_v35 = vmul.f32 %v686_v29, %v1861_v2 }
 0x197   :  { %1190 = vmatpush1.bf16.msra.mxu0 %v1584_v25  ;;  %v691_v34 = vmul.f32 0.5, %v675_v32  ;;  %v703_v39 = vmul.f32 %v687_v0, %v1863_v6 }
 0x198   :  { %v706_v36 = vmul.f32 %v690_v3, %v1867_v10  ;;  %1191 = vmatprep.subr.bf16.mxu0 %v1589_v57 }
 0x199   :  { %v1615_v38 = vpop.eup %1614  ;;  %v707_v40 = vmul.f32 %v691_v34, %v1871_v12 }
 0x19a   :  { %v1617_v41 = vpop.eup %1616  ;;  %v718_v42 = vpack.c.bf16 %v706_v36, %v702_v35  ;;  %v678_v18 = vadd.f32 1.0, %v1615_v38 }
 0x19b   :  { %v1619_v43 = vpop.eup %1618  ;;  %1192 = vmatpush1.bf16.msra.mxu0 %v1587_v33  ;;  %v719_v24 = vpack.c.bf16 %v707_v40, %v703_v39  ;;  %v679_v27 = vadd.f32 1.0, %v1617_v41 }
 0x19c   :  { %v1621_v46 = vpop.eup %1620  ;;  %v682_v49 = vadd.f32 1.0, %v1619_v43  ;;  %v694_v54 = vmul.f32 0.5, %v678_v18 }
 0x19d   :  { %1193 = vmatprep.mubr.bf16.mxu0 %v719_v24  ;;  %v683_v2 = vadd.f32 1.0, %v1621_v46  ;;  %v695_v55 = vmul.f32 0.5, %v679_v27 }
 0x19e   :  { %1194 = vmatmul.mubr.bf16.vlgmr.msra.gmra.mrb[0].mxu0 %v718_v42  ;;  %v698_v10 = vmul.f32 0.5, %v682_v49  ;;  %v710_v6 = vmul.f32 %v694_v54, %v1882_v30  ;;  %v1231_v30 = vrot.slane %v1222_v4, %v132_v53 }
 0x19f   :  { %v699_v56 = vmul.f32 0.5, %v683_v2  ;;  %v711_v60 = vmul.f32 %v695_v55, %v1885_v61 }
 0x1a0   :  { %v714_v12 = vmul.f32 %v698_v10, %v1890_v37 }
 0x1a1   :  { %v715_v62 = vmul.f32 %v699_v56, %v1895_v15  ;;  %v1622_v15 = vld [vmem:[%s1960_s0 + $0x8] sm:$0xff] }
 0x1a2   :  { %v722_v63 = vpack.c.bf16 %v714_v12, %v710_v6 }
 0x1a3   :  { %v723_v1 = vpack.c.bf16 %v715_v62, %v711_v60 }
 0x1a5   :  { %1203 = vmatprep.mubr.bf16.mxu0 %v723_v1 }
 0x1a6   :  { %1204 = vmatmul.mubr.bf16.gmra.mrb[4].mxu0 %v722_v63 }
 0x271   :  { %v1195_v7 = vpop.f32.mrb[0].mxu0 }
 0x272   :  { %v1214_v37 = vadd.f32 %v1195_v7, %v1744_v44  ;;  %v1197_v61 = vpop.f32.mrb[1].mxu0 }
 0x273   :  { %v1215_v8 = vadd.f32 %v1622_v15, %v1197_v61  ;;  %v1199_v9 = vpop.f32.mrb[2].mxu0 }
 0x274   :  { %v1234_v11 = vadd.f32 %v1227_v5, %v1214_v37  ;;  %v1216_v52 = vadd.f32 %v1199_v9, %v1749_v45  ;;  %v1201_v13 = vpop.f32.mrb[3].mxu0 }
 0x275   :  { %v1235_v14 = vadd.f32 %v1231_v30, %v1215_v8  ;;  %v1217_v50 = vadd.f32 %v1623_v51, %v1201_v13 }
 0x276   :  { %1242 = vst [vmem:[%s1965_s5] sm:$0xff] %v1234_v11  ;;  %v1236_v44 = vadd.f32 %v1227_v5, %v1216_v52 }
 0x277   :  { %1243 = vst [vmem:[%s1965_s5 + $0x8] sm:$0xff] %v1235_v14  ;;  %v1237_v53 = vadd.f32 %v1231_v30, %v1217_v50 }
 0x278   :  { %1244 = vst [vmem:[%s1965_s5 + $0x10] sm:$0xff] %v1236_v44 }
 0x279   :  { %1245 = vst [vmem:[%s1965_s5 + $0x18] sm:$0xff] %v1237_v53  ;;  %v1205_v45 = vpop.f32.mrb[4].mxu0 }
 0x27a   :  { %v1218_v16 = vadd.f32 %v1205_v45, %v1772_v58  ;;  %v1207_v17 = vpop.f32.mrb[5].mxu0 }
 0x27b   :  { %v1219_v19 = vadd.f32 %v1207_v17, %v1754_v47  ;;  %v1209_v20 = vpop.f32.mrb[6].mxu0 }
 0x27c   :  { %v1238_v21 = vadd.f32 %v1227_v5, %v1218_v16  ;;  %v1220_v22 = vadd.f32 %v1209_v20, %v1777_v59  ;;  %v1211_v23 = vpop.f32.mrb[7].mxu0 }
 0x27d   :  { %v1239_v25 = vadd.f32 %v1231_v30, %v1219_v19  ;;  %v1221_v26 = vadd.f32 %v1211_v23, %v1759_v48 }
 0x27e   :  { %1246 = vst [vmem:[%s1965_s5 + $0x20] sm:$0xff] %v1238_v21  ;;  %v1240_v28 = vadd.f32 %v1227_v5, %v1220_v22 }
 0x27f   :  { %1247 = vst [vmem:[%s1965_s5 + $0x28] sm:$0xff] %v1239_v25  ;;  %v1241_v58 = vadd.f32 %v1231_v30, %v1221_v26 }
 0x280   :  { %1248 = vst [vmem:[%s1965_s5 + $0x30] sm:$0xff] %v1240_v28 }
 0x281   :  { %1249 = vst [vmem:[%s1965_s5 + $0x38] sm:$0xff] %v1241_v58 }
 0x282   :  { %1254 = vsyncpa [#allocation3], 1 }
 0x283   :  { %1255 = vsyncpa [#allocation5], 1 }

</bundles_post_ra>
